<compile_context>
chip_gen: v7x
topology: tpu7x:2x2x1
jax: 0.10.0
libtpu: 0.0.40
codegen_flags: <defaults>
</compile_context>

<pallas_src>
import jax
import jax.numpy as jnp
from jax.experimental import pallas as pl
from jax.experimental.pallas import tpu as pltpu


def _frozen_bn_kernel(x_ref, scale_ref, bias_ref, o_ref):
    # x_ref: (row_block, hw_block); scale_ref/bias_ref: (row_block, 1) f32.
    # VPU-only body; DMA is the binding slot, so the f32 upcast + FMA is free.
    xf = x_ref[...].astype(jnp.float32)
    o_ref[...] = (xf * scale_ref[...] + bias_ref[...]).astype(o_ref.dtype)


def frozen_batch_norm_2d(x, weight, bias, running_mean, running_var,
                         eps=1e-5, target_tile_bytes=4 << 20):
    """x: (N, C, H, W); weight/bias/running_mean/running_var: (C,) f32 buffers."""
    N, C, H, W = x.shape
    NC, HW = N * C, H * W
    itemsize = jnp.dtype(x.dtype).itemsize
    sublane = {4: 8, 2: 16, 1: 32}.get(itemsize, 8)

    # --- scale / bias computed once, in f32 (matches PyTorch numerics) -------
    w32 = weight.astype(jnp.float32)
    b32 = bias.astype(jnp.float32)
    rm32 = running_mean.astype(jnp.float32)
    rv32 = running_var.astype(jnp.float32)
    scale_c = w32 * jax.lax.rsqrt(rv32 + jnp.float32(eps))      # (C,)
    bias_c = b32 - rm32 * scale_c                               # (C,)

    # --- tile sizing: lane axis as wide as possible ---------------------------
    # Widest legal lane block within the tile budget (multiple of 128), or the
    # full HW extent (the "(8,128) or full-dim" rule), whichever applies.
    max_lane = max(128, (target_tile_bytes // (sublane * itemsize)) // 128 * 128)
    if HW <= max_lane:
        hw_block = HW                 # full lane extent: one block, no j tail
    else:
        hw_block = max_lane           # multiple of 128; cdiv grid masks the tail

    rows = max(sublane, target_tile_bytes // max(hw_block * itemsize, 1))
    rows = max(sublane, (rows // sublane) * sublane)
    row_block = NC if NC <= rows else rows   # full dim or multiple of sublane

    grid = (pl.cdiv(NC, row_block), pl.cdiv(HW, hw_block))

    # --- operands (no padding of x; params are tiny, Pallas masks tails) ------
    x2d = x.reshape(NC, HW)                                   # free bitcast
    scale_rows = jnp.tile(scale_c, N).reshape(NC, 1)          # row r -> channel r % C
    bias_rows = jnp.tile(bias_c, N).reshape(NC, 1)

    x_spec = pl.BlockSpec((row_block, hw_block), lambda i, j: (i, j))
    p_spec = pl.BlockSpec((row_block, 1), lambda i, j: (i, 0))

    cost = pl.CostEstimate(
        flops=2 * NC * HW,
        transcendentals=0,
        bytes_accessed=2 * NC * HW * itemsize + 2 * NC * 4,
    )

    out2d = pl.pallas_call(
        _frozen_bn_kernel,
        out_shape=jax.ShapeDtypeStruct((NC, HW), x.dtype),
        grid_spec=pltpu.PrefetchScalarGridSpec(
            num_scalar_prefetch=0,
            grid=grid,
            in_specs=[x_spec, p_spec, p_spec],
            out_specs=x_spec,
        ),
        compiler_params=pltpu.CompilerParams(
            dimension_semantics=("parallel", "parallel"),
            # 4 MiB tiles * (in + out) * double-buffering = 16 MiB; request
            # 32 MiB scoped VMEM so v5e (16 MiB default) also compiles; still
            # comfortably under v7x's 64 MiB physical VMEM.
            vmem_limit_bytes=32 * 1024 * 1024,
        ),
        cost_estimate=cost,
    )(x2d, scale_rows, bias_rows)

    return out2d.reshape(N, C, H, W)


if __name__ == "__main__":
    key = jax.random.PRNGKey(0)

    def ref_fn(x, w, b, rm, rv, eps=1e-5):
        C = x.shape[1]
        scale = w.reshape(1, C, 1, 1) * jax.lax.rsqrt(
            rv.reshape(1, C, 1, 1) + jnp.float32(eps))
        bias = b.reshape(1, C, 1, 1) - rm.reshape(1, C, 1, 1) * scale
        return x * scale + bias

    def run_case(k, shape, **kwargs):
        N, C, H, W = shape
        kx, kw, kb, km, kv = jax.random.split(k, 5)
        x = jax.random.normal(kx, shape, dtype=jnp.float32)
        w = jax.random.normal(kw, (C,), dtype=jnp.float32)
        b = jax.random.normal(kb, (C,), dtype=jnp.float32)
        rm = jax.random.normal(km, (C,), dtype=jnp.float32)
        rv = jax.random.uniform(kv, (C,), dtype=jnp.float32,
                                minval=0.5, maxval=2.0)
        out = frozen_batch_norm_2d(x, w, b, rm, rv, **kwargs)
        out = jax.block_until_ready(out)
        assert out.shape == shape
        assert jnp.allclose(out, ref_fn(x, w, b, rm, rv), atol=1e-5, rtol=1e-5)

    k1, k2, k3 = jax.random.split(key, 3)
    # Aligned shape: single big lane-dense tile.
    run_case(k1, (2, 4, 16, 16))
    # HW not a multiple of the lane block: exercises the masked trailing
    # j-block (the previous version's truncation bug path).
    run_case(k2, (2, 4, 16, 20), target_tile_bytes=4096)
    # NC not a multiple of the row block: exercises the masked trailing i-block.
    run_case(k3, (3, 4, 8, 16), target_tile_bytes=4096)

    print("KERNEL_OK")
</pallas_src>

<mosaic_0001>
module attributes {stable_mosaic.version = 11 : i64} {
  func.func @_frozen_bn_kernel(%arg0: i32, %arg1: i32, %arg2: memref<8x256xf32, #tpu.memory_space<vmem>>, %arg3: memref<8x1xf32, #tpu.memory_space<vmem>>, %arg4: memref<8x1xf32, #tpu.memory_space<vmem>>, %arg5: memref<8x256xf32, #tpu.memory_space<vmem>>) attributes {dimension_semantics = [#tpu.dimension_semantics<parallel>, #tpu.dimension_semantics<parallel>], iteration_bounds = array<i64: 1, 1>, scalar_prefetch = 0 : i64, scratch_operands = 0 : i64, tpu.core_type = #tpu.core_type<tc>, window_params = [{transform_indices = @transform_0, window_bounds = array<i64: 8, 256>}, {transform_indices = @transform_1, window_bounds = array<i64: 8, 1>}, {transform_indices = @transform_2, window_bounds = array<i64: 8, 1>}, {transform_indices = @transform_3, window_bounds = array<i64: 8, 256>}]} {
    %c0 = arith.constant 0 : index
    %c0_0 = arith.constant 0 : index
    %0 = vector.load %arg2[%c0, %c0_0] : memref<8x256xf32, #tpu.memory_space<vmem>>, vector<8x256xf32>
    %c0_1 = arith.constant 0 : index
    %c0_2 = arith.constant 0 : index
    %1 = vector.load %arg3[%c0_1, %c0_2] : memref<8x1xf32, #tpu.memory_space<vmem>>, vector<8x1xf32>
    %2 = vector.broadcast %1 : vector<8x1xf32> to vector<8x256xf32>
    %3 = arith.mulf %0, %2 : vector<8x256xf32>
    %c0_3 = arith.constant 0 : index
    %c0_4 = arith.constant 0 : index
    %4 = vector.load %arg4[%c0_3, %c0_4] : memref<8x1xf32, #tpu.memory_space<vmem>>, vector<8x1xf32>
    %5 = vector.broadcast %4 : vector<8x1xf32> to vector<8x256xf32>
    %6 = arith.addf %3, %5 : vector<8x256xf32>
    %c0_5 = arith.constant 0 : index
    %c0_6 = arith.constant 0 : index
    %7 = vector.load %arg5[%c0_5, %c0_6] : memref<8x256xf32, #tpu.memory_space<vmem>>, vector<8x256xf32>
    tpu.vector_store %arg5[%c0_5, %c0_6], %6 {strides = array<i32>} : memref<8x256xf32, #tpu.memory_space<vmem>>, vector<8x256xf32>,
    return
  }
  func.func @transform_0(%arg0: i32, %arg1: i32) -> (i32, i32) {
    %c0_i32 = arith.constant 0 : i32
    return %arg0, %arg1 : i32, i32
  }
  func.func @transform_1(%arg0: i32, %arg1: i32) -> (i32, i32) {
    %c0_i32 = arith.constant 0 : i32
    %c0_i32_0 = arith.constant 0 : i32
    return %arg0, %c0_i32 : i32, i32
  }
  func.func @transform_2(%arg0: i32, %arg1: i32) -> (i32, i32) {
    %c0_i32 = arith.constant 0 : i32
    %c0_i32_0 = arith.constant 0 : i32
    return %arg0, %c0_i32 : i32, i32
  }
  func.func @transform_3(%arg0: i32, %arg1: i32) -> (i32, i32) {
    %c0_i32 = arith.constant 0 : i32
    return %arg0, %arg1 : i32, i32
  }
}

</mosaic_0001>

<bundles_post_ra>
// kernel: tpu_custom_call.1
= control target key start
LH: loop header
LB: loop body
LE: loop exit
PB: predicated region body
PF: predicated region fallthrough
CT: control target
= control target key end

     0   :  { %s122_s0 = inlined_call_operand.vmem [shape: f32[8,256], index: 0, kind: input, shape index: {}]   ;;  %s123_s1 = inlined_call_operand.vmem [shape: f32[8,1], index: 1, kind: input, shape index: {}]   ;;  %s124_s2 = inlined_call_operand.vmem [shape: f32[8,1], index: 2, kind: input, shape index: {}]   ;;  %s125_s3 = inlined_call_operand.hbm [shape: f32[8,256], index: 3, kind: output, shape index: {}]  }
   0x1   :  { %v17_v0 = vld [vmem:[%s123_s1] sm:$0xff] }
   0x2   :  { %8 = vsyncpa [#allocation3], 0  ;;  %v76_v1 = vmov 0   ;;  %v25_v2 = vld [vmem:[%s124_s2] sm:$0xff]  ;;  %v16_v5 = vld [vmem:[%s122_s0 + $0x8] sm:$0xff]  ;;  %s77_s20 = smov [#allocation2]  }
   0x3   :  { %51 = vset.pattern.permute.xlu0 %v76_v1  ;;  %v15_v4 = vld [vmem:[%s122_s0] sm:$0xff]  ;;  %s41_s1 = sshll.u32 %s77_s20, 4  ;;  %s42_s1 = int_to_ptr.vmem [resolvable:$true] %s41_s1 }
   0x4   :  { %20 = vperm.xlu0 %51, %v17_v0   ;;  %s52_s2 = scalar_lea.vmem %s42_s1, 256  ;;  %p57_p1 = scmp.lt.s32.totalorder %s42_s1, %s42_s1 }
   0x5   :  { %p53_p0 = scmp.ne.s32.totalorder %s42_s1, %s52_s2  ;;  %p58_p2 = scmp.lt.s32.totalorder %s52_s2, %s52_s2 }
   0x7   :  { %p59_p3 = por %p58_p2, %p57_p1 }
   0x8   :  { %28 = vperm.xlu0 %51, %v25_v2  }
   0x9   :  { %p60_p4 = pnand %p59_p3, %p53_p0 }
  0x83   :  { %v21_v3 = vpop.permute.xlu0 %20 }
  0x84   :  { %v23_v6 = vmul.f32 %v21_v3, %v15_v4  ;;  %v24_v7 = vmul.f32 %v21_v3, %v16_v5 }
  0x87   :  { %v29_v8 = vpop.permute.xlu0 %28 }
  0x88   :  { %v31_v9 = vadd.f32 %v29_v8, %v23_v6  ;;  %v32_v10 = vadd.f32 %v29_v8, %v24_v7 }
  0x8a   :  { %33 = vst [vmem:[#allocation2] sm:$0xff] %v31_v9  ;;  %34 = vst [vmem:[#allocation2 + $0x8] sm:$0xff] %v32_v10 }
  0x8b   :  { %63 = shalt.err (!%p60_p4)
}
  0x8c   :  { %s64_s0 = scalar_lea.hbm %s125_s3, 256 }
  0x8d   :  { %p65_p5 = scmp.ne.s32.totalorder %s125_s3, %s64_s0  ;;  %p68_p6 = scmp.lt.u32.totalorder %s64_s0, %s125_s3 }
  0x8f   :  { %p70_p7 = pnand %p68_p6, %p65_p5 }
  0x91   :  { %73 = shalt.err (!%p70_p7)
}
  0x92   :  { %44 = dma.vmem_to_hbm [thread:$0]  %s42_s1, 256, %s125_s3, [#allocation3]  }
  0x93   :  { %74 = dma.done.wait [#allocation3], 256  }
  0x94   :  { %75 = vsyncadd [#allocation3], 4294967040 }
  0x95   :  { %48 = vsyncpa [#allocation3], 1 }

</bundles_post_ra>
